<compile_context>
chip_gen: v7x
topology: tpu7x:2x2x1
jax: 0.10.0
libtpu: 0.0.40
codegen_flags: <defaults>
</compile_context>

<pallas_src>
import functools

import jax
import jax.numpy as jnp
from jax.experimental import pallas as pl
from jax.experimental.pallas import tpu as pltpu


# --------------------------------------------------------------------------- #
# Kernel
# --------------------------------------------------------------------------- #
def _fused_kernel(x_ref, w1_ref, b1_ref, w2_ref, b2_ref, o_ref, *, approx_recip):
    # recog_model: logits = x @ W1 + b1.
    # Operands are cast to bf16 in-register (cheap VPU op, hidden under the
    # MXU) so the wrapper never issues a separate XLA convert pass over HBM.
    x = x_ref[...].astype(jnp.bfloat16)
    w1 = w1_ref[...].astype(jnp.bfloat16)
    logits = jnp.dot(x, w1, preferred_element_type=jnp.float32)
    logits = logits + b1_ref[...].astype(jnp.float32)

    # softmax over dim=1 (the class / last axis of the 2-D logits), in f32.
    m = jnp.max(logits, axis=-1, keepdims=True)          # XLU reduce
    e = jnp.exp(logits - m)                               # EUP
    denom = jnp.sum(e, axis=-1, keepdims=True)            # XLU reduce
    if approx_recip:
        inv = pl.reciprocal(denom, approx=True)           # EUP vrcp (free slot)
    else:
        inv = 1.0 / denom                                  # exact row-sums == 1
    probs = (e * inv).astype(jnp.bfloat16)

    # gen_model: y = probs @ W2 + b2
    w2 = w2_ref[...].astype(jnp.bfloat16)
    y = jnp.dot(probs, w2, preferred_element_type=jnp.float32)
    y = y + b2_ref[...].astype(jnp.float32)
    o_ref[...] = y.astype(o_ref.dtype)


# --------------------------------------------------------------------------- #
# Helpers
# --------------------------------------------------------------------------- #
@functools.cache
def _supports_single_buffering() -> bool:
    """Explicit capability probe (NOT a silent fallback around the real kernel):
    compiles a trivial one-tile kernel with BlockSpec(pipeline_mode=pl.Buffered(1))
    exactly once per process.  Failures of the real kernel are never masked."""
    if not hasattr(pl, "Buffered"):
        return False

    def _probe(x_ref, o_ref):
        o_ref[...] = x_ref[...]

    try:
        out = pl.pallas_call(
            _probe,
            out_shape=jax.ShapeDtypeStruct((8, 128), jnp.float32),
            grid=(1,),
            in_specs=[pl.BlockSpec((8, 128), lambda i: (0, 0),
                                   pipeline_mode=pl.Buffered(1))],
            out_specs=pl.BlockSpec((8, 128), lambda i: (0, 0)),
        )(jnp.zeros((8, 128), jnp.float32))
        jax.block_until_ready(out)
        return True
    except Exception:
        return False


def _choose_tile_b(B, max_tile=1024, min_grid=4):
    """Largest batch tile that divides B, is a multiple of 8 sublanes, is at
    most `max_tile`, and leaves at least `min_grid` grid steps when possible
    (>= 2 steps per TensorCore on a v7x megacore so the next x-tile DMA and the
    previous output writeback are hidden under compute)."""
    candidates = [t for t in range(8, min(max_tile, B) + 1, 8) if B % t == 0]
    if not candidates:
        return B                    # tiny batch: single full-extent block
    pipelined = [t for t in candidates if B // t >= min_grid]
    return max(pipelined) if pipelined else max(candidates)


def _compute_vmem_limit(tile_b, H, C, O, *, x_bytes, w_bytes, b_bytes,
                        out_bytes, single_buf):
    """Generation-aware VMEM budget from actual buffer sizes: 2x-buffered
    x/out tiles, 1x (or 2x) resident weights/biases, the f32 softmax
    temporaries, plus headroom — clamped to 3/4 of physical VMEM."""
    w_bufs = 1 if single_buf else 2
    x_tile = 2 * tile_b * H * x_bytes
    o_tile = 2 * tile_b * O * out_bytes
    weights = w_bufs * (H * C + C * O) * w_bytes
    biases = w_bufs * 8 * (C + O) * max(b_bytes, 4)   # (1,C)/(1,O) pad to 8 sublanes
    softmax_tmp = 3 * tile_b * C * 4                  # logits / e / probs in f32
    total = x_tile + o_tile + weights + biases + softmax_tmp
    limit = int(total * 1.5) + (4 << 20)              # scheduling / spill headroom
    try:
        info = pltpu.get_tpu_info()
        cap = int(getattr(info, "vmem_capacity_bytes", 64 << 20))
    except Exception:
        cap = 64 << 20                                # conservative (v7x) default
    return max(16 << 20, min(limit, (cap * 3) // 4))


# --------------------------------------------------------------------------- #
# Wrapper
# --------------------------------------------------------------------------- #
def speech_recog_gen_forward(x, w1, b1, w2, b2, *, tile_b=None,
                             out_dtype=jnp.bfloat16,
                             approx_reciprocal=True):
    """Fused  gen_model(softmax(recog_model(x), dim=1))  forward pass on TPU.

    x:  [B, H] (any float dtype; cast to bf16 inside the kernel)
    w1: [H, C], b1: [C] or [1, C]   (recog_model Linear)
    w2: [C, O], b2: [O] or [1, O]   (gen_model  Linear)

    Store weights in bf16 upstream to avoid any per-call conversion traffic.
    Set approx_reciprocal=False if downstream needs posterior rows to sum to 1
    at full f32 accuracy.
    """
    B, H = x.shape
    H2, C = w1.shape
    C2, O = w2.shape
    assert H == H2 and C == C2, "weight shapes inconsistent with x"

    if tile_b is None:
        tile_b = _choose_tile_b(B)
    tile_b = min(tile_b, B)
    assert B % tile_b == 0, "batch must be divisible by the batch tile"
    assert tile_b == B or tile_b % 8 == 0, \
        "batch tile must be a multiple of 8 sublanes (or the full batch)"
    # Lane-dense panels: full MXU columns and unmasked (non vst.msk) output stores.
    assert H % 128 == 0 and C % 128 == 0 and O % 128 == 0, \
        "pad H/C/O to multiples of 128 lanes before calling the kernel"

    b1v = b1.reshape(1, C)
    b2v = b2.reshape(1, O)

    single_buf = _supports_single_buffering()
    wkw = dict(pipeline_mode=pl.Buffered(1)) if single_buf else {}

    vmem_limit = _compute_vmem_limit(
        tile_b, H, C, O,
        x_bytes=x.dtype.itemsize,
        w_bytes=max(w1.dtype.itemsize, w2.dtype.itemsize),
        b_bytes=max(b1v.dtype.itemsize, b2v.dtype.itemsize),
        out_bytes=jnp.dtype(out_dtype).itemsize,
        single_buf=single_buf)

    kernel = functools.partial(_fused_kernel, approx_recip=approx_reciprocal)

    return pl.pallas_call(
        kernel,
        out_shape=jax.ShapeDtypeStruct((B, O), out_dtype),
        grid_spec=pltpu.PrefetchScalarGridSpec(
            num_scalar_prefetch=0,
            grid=(B // tile_b,),
            in_specs=[
                pl.BlockSpec((tile_b, H), lambda i: (i, 0)),      # x tile (2x buffered)
                pl.BlockSpec((H, C), lambda i: (0, 0), **wkw),    # W1 (resident)
                pl.BlockSpec((1, C), lambda i: (0, 0), **wkw),    # b1 (resident)
                pl.BlockSpec((C, O), lambda i: (0, 0), **wkw),    # W2 (resident)
                pl.BlockSpec((1, O), lambda i: (0, 0), **wkw),    # b2 (resident)
            ],
            out_specs=pl.BlockSpec((tile_b, O), lambda i: (i, 0)),
        ),
        compiler_params=pltpu.CompilerParams(
            dimension_semantics=("parallel",),
            vmem_limit_bytes=vmem_limit,
        ),
    )(x, w1, b1v, w2, b2v)


def reference_forward(x, w1, b1, w2, b2):
    logits = x @ w1 + b1.reshape(1, -1)
    probs = jax.nn.softmax(logits, axis=1)
    return probs @ w2 + b2.reshape(1, -1)


if __name__ == "__main__":
    # Small, lane-dense, MXU-friendly demo shapes: batch=512 (auto tile of 128
    # rows -> 4 "parallel" grid steps, i.e. >= 2 per TensorCore on a v7x
    # megacore), H = C = O = 128.
    B, H, C, O = 512, 128, 128, 128

    key = jax.random.PRNGKey(0)
    kx, k1, kb1, k2, kb2 = jax.random.split(key, 5)

    # Activations stay f32 (cast to bf16 inside the kernel); weights are stored
    # in bf16 up front so no per-call conversion pass over HBM is needed.
    x = jax.random.normal(kx, (B, H), dtype=jnp.float32)
    w1 = (jax.random.normal(k1, (H, C), dtype=jnp.float32) * 0.1).astype(jnp.bfloat16)
    b1 = jax.random.normal(kb1, (1, C), dtype=jnp.float32) * 0.1
    w2 = (jax.random.normal(k2, (C, O), dtype=jnp.float32) * 0.1).astype(jnp.bfloat16)
    b2 = jax.random.normal(kb2, (1, O), dtype=jnp.float32) * 0.1

    out = speech_recog_gen_forward(x, w1, b1, w2, b2)
    out = jax.block_until_ready(out)

    # Reference on the same bf16-rounded operands (matches the kernel's MXU
    # input precision); approx reciprocal / bf16 probs+output loosen tolerance.
    xb = x.astype(jnp.bfloat16).astype(jnp.float32)
    ref = reference_forward(xb, w1.astype(jnp.float32), b1,
                            w2.astype(jnp.float32), b2)

    assert out.shape == (B, O)
    assert out.dtype == jnp.bfloat16
    assert jnp.allclose(out.astype(jnp.float32), ref, atol=1e-2, rtol=5e-2), \
        "mismatch vs reference"

    print("KERNEL_OK")
</pallas_src>

<mosaic_0001>
module attributes {stable_mosaic.version = 11 : i64} {
  func.func @_probe(%arg0: i32, %arg1: memref<8x128xf32, #tpu.memory_space<vmem>>, %arg2: memref<8x128xf32, #tpu.memory_space<vmem>>) attributes {dimension_semantics = [#tpu.dimension_semantics<arbitrary>], iteration_bounds = array<i64: 1>, scalar_prefetch = 0 : i64, scratch_operands = 0 : i64, tpu.core_type = #tpu.core_type<tc>, window_params = [{pipeline_mode = #tpu.pipeline_mode<synchronous>, transform_indices = @transform_0, window_bounds = array<i64: 8, 128>}, {pipeline_mode = #tpu.pipeline_mode<synchronous>, transform_indices = @transform_1, window_bounds = array<i64: 8, 128>}]} {
    %c0 = arith.constant 0 : index
    %c0_0 = arith.constant 0 : index
    %0 = vector.load %arg1[%c0, %c0_0] : memref<8x128xf32, #tpu.memory_space<vmem>>, vector<8x128xf32>
    %c0_1 = arith.constant 0 : index
    %c0_2 = arith.constant 0 : index
    %1 = vector.load %arg2[%c0_1, %c0_2] : memref<8x128xf32, #tpu.memory_space<vmem>>, vector<8x128xf32>
    tpu.vector_store %arg2[%c0_1, %c0_2], %0 {strides = array<i32>} : memref<8x128xf32, #tpu.memory_space<vmem>>, vector<8x128xf32>,
    return
  }
  func.func @transform_0(%arg0: i32) -> (i32, i32) {
    %c0_i32 = arith.constant 0 : i32
    %c0_i32_0 = arith.constant 0 : i32
    %c0_i32_1 = arith.constant 0 : i32
    return %c0_i32, %c0_i32_0 : i32, i32
  }
  func.func @transform_1(%arg0: i32) -> (i32, i32) {
    %c0_i32 = arith.constant 0 : i32
    %c0_i32_0 = arith.constant 0 : i32
    %c0_i32_1 = arith.constant 0 : i32
    return %c0_i32, %c0_i32_0 : i32, i32
  }
}

module attributes {stable_mosaic.version = 11 : i64} {
  func.func @_fused_kernel(%arg0: i32, %arg1: memref<128x128xf32, #tpu.memory_space<vmem>>, %arg2: memref<128x128xbf16, #tpu.memory_space<vmem>>, %arg3: memref<1x128xf32, #tpu.memory_space<vmem>>, %arg4: memref<128x128xbf16, #tpu.memory_space<vmem>>, %arg5: memref<1x128xf32, #tpu.memory_space<vmem>>, %arg6: memref<128x128xbf16, #tpu.memory_space<vmem>>) attributes {dimension_semantics = [#tpu.dimension_semantics<parallel>], iteration_bounds = array<i64: 4>, scalar_prefetch = 0 : i64, scratch_operands = 0 : i64, tpu.core_type = #tpu.core_type<tc>, window_params = [{transform_indices = @transform_0, window_bounds = array<i64: 128, 128>}, {pipeline_mode = #tpu.pipeline_mode<synchronous>, transform_indices = @transform_1, window_bounds = array<i64: 128, 128>}, {pipeline_mode = #tpu.pipeline_mode<synchronous>, transform_indices = @transform_2, window_bounds = array<i64: 1, 128>}, {pipeline_mode = #tpu.pipeline_mode<synchronous>, transform_indices = @transform_3, window_bounds = array<i64: 128, 128>}, {pipeline_mode = #tpu.pipeline_mode<synchronous>, transform_indices = @transform_4, window_bounds = array<i64: 1, 128>}, {transform_indices = @transform_5, window_bounds = array<i64: 128, 128>}]} {
    %c0 = arith.constant 0 : index
    %c0_0 = arith.constant 0 : index
    %0 = vector.load %arg1[%c0, %c0_0] : memref<128x128xf32, #tpu.memory_space<vmem>>, vector<128x128xf32>
    %1 = arith.truncf %0 : vector<128x128xf32> to vector<128x128xbf16>
    %c0_1 = arith.constant 0 : index
    %c0_2 = arith.constant 0 : index
    %2 = vector.load %arg2[%c0_1, %c0_2] : memref<128x128xbf16, #tpu.memory_space<vmem>>, vector<128x128xbf16>
    %cst = arith.constant dense<0.000000e+00> : vector<128x128xf32>
    %3 = tpu.matmul %1, %2, %cst {dimension_numbers = #tpu.dot_dimension_numbers<[1], [0], [0], [1], [0, 0, 1, 1], [], []>} : vector<128x128xbf16>, vector<128x128xbf16>, vector<128x128xf32> -> vector<128x128xf32>
    %c0_3 = arith.constant 0 : index
    %c0_4 = arith.constant 0 : index
    %4 = vector.load %arg3[%c0_3, %c0_4] : memref<1x128xf32, #tpu.memory_space<vmem>>, vector<1x128xf32>
    %5 = vector.broadcast %4 : vector<1x128xf32> to vector<128x128xf32>
    %6 = arith.addf %3, %5 : vector<128x128xf32>
    %cst_5 = arith.constant dense<0xFF800000> : vector<128xf32>
    %7 = vector.multi_reduction <maximumf>, %6, %cst_5 [1] : vector<128x128xf32> to vector<128xf32>
    %8 = vector.shape_cast %7 : vector<128xf32> to vector<128x1xf32>
    %9 = vector.broadcast %8 : vector<128x1xf32> to vector<128x128xf32>
    %10 = arith.subf %6, %9 : vector<128x128xf32>
    %11 = math.exp %10 : vector<128x128xf32>
    %cst_6 = arith.constant dense<0.000000e+00> : vector<128xf32>
    %12 = vector.multi_reduction <add>, %11, %cst_6 [1] : vector<128x128xf32> to vector<128xf32>
    %13 = vector.shape_cast %12 : vector<128xf32> to vector<128x1xf32>
    %14 = tpu.reciprocal %13 {approx = true} : vector<128x1xf32> -> vector<128x1xf32>
    %15 = vector.broadcast %14 : vector<128x1xf32> to vector<128x128xf32>
    %16 = arith.mulf %11, %15 : vector<128x128xf32>
    %17 = arith.truncf %16 : vector<128x128xf32> to vector<128x128xbf16>
    %c0_7 = arith.constant 0 : index
    %c0_8 = arith.constant 0 : index
    %18 = vector.load %arg4[%c0_7, %c0_8] : memref<128x128xbf16, #tpu.memory_space<vmem>>, vector<128x128xbf16>
    %cst_9 = arith.constant dense<0.000000e+00> : vector<128x128xf32>
    %19 = tpu.matmul %17, %18, %cst_9 {dimension_numbers = #tpu.dot_dimension_numbers<[1], [0], [0], [1], [0, 0, 1, 1], [], []>} : vector<128x128xbf16>, vector<128x128xbf16>, vector<128x128xf32> -> vector<128x128xf32>
    %c0_10 = arith.constant 0 : index
    %c0_11 = arith.constant 0 : index
    %20 = vector.load %arg5[%c0_10, %c0_11] : memref<1x128xf32, #tpu.memory_space<vmem>>, vector<1x128xf32>
    %21 = vector.broadcast %20 : vector<1x128xf32> to vector<128x128xf32>
    %22 = arith.addf %19, %21 : vector<128x128xf32>
    %23 = arith.truncf %22 : vector<128x128xf32> to vector<128x128xbf16>
    %c0_12 = arith.constant 0 : index
    %c0_13 = arith.constant 0 : index
    %24 = vector.load %arg6[%c0_12, %c0_13] : memref<128x128xbf16, #tpu.memory_space<vmem>>, vector<128x128xbf16>
    tpu.vector_store %arg6[%c0_12, %c0_13], %23 {strides = array<i32>} : memref<128x128xbf16, #tpu.memory_space<vmem>>, vector<128x128xbf16>,
    return
  }
  func.func @transform_0(%arg0: i32) -> (i32, i32) {
    %c0_i32 = arith.constant 0 : i32
    %c0_i32_0 = arith.constant 0 : i32
    return %arg0, %c0_i32 : i32, i32
  }
  func.func @transform_1(%arg0: i32) -> (i32, i32) {
    %c0_i32 = arith.constant 0 : i32
    %c0_i32_0 = arith.constant 0 : i32
    %c0_i32_1 = arith.constant 0 : i32
    return %c0_i32, %c0_i32_0 : i32, i32
  }
  func.func @transform_2(%arg0: i32) -> (i32, i32) {
    %c0_i32 = arith.constant 0 : i32
    %c0_i32_0 = arith.constant 0 : i32
    %c0_i32_1 = arith.constant 0 : i32
    return %c0_i32, %c0_i32_0 : i32, i32
  }
  func.func @transform_3(%arg0: i32) -> (i32, i32) {
    %c0_i32 = arith.constant 0 : i32
    %c0_i32_0 = arith.constant 0 : i32
    %c0_i32_1 = arith.constant 0 : i32
    return %c0_i32, %c0_i32_0 : i32, i32
  }
  func.func @transform_4(%arg0: i32) -> (i32, i32) {
    %c0_i32 = arith.constant 0 : i32
    %c0_i32_0 = arith.constant 0 : i32
    %c0_i32_1 = arith.constant 0 : i32
    return %c0_i32, %c0_i32_0 : i32, i32
  }
  func.func @transform_5(%arg0: i32) -> (i32, i32) {
    %c0_i32 = arith.constant 0 : i32
    %c0_i32_0 = arith.constant 0 : i32
    return %arg0, %c0_i32 : i32, i32
  }
}

</mosaic_0001>

<bundles_post_ra>
// kernel: tpu_custom_call.1
= control target key start
LH: loop header
LB: loop body
LE: loop exit
PB: predicated region body
PF: predicated region fallthrough
CT: control target
= control target key end

     0   :  { %6 = vsyncpa [#allocation3], 0  ;;  %s124_s0 = inlined_call_operand.hbm [shape: f32[8,128], index: 0, kind: input, shape index: {}]   ;;  %s125_s1 = inlined_call_operand.hbm [shape: f32[8,128], index: 1, kind: output, shape index: {}]  }
   0x1   :  { %7 = vsyncpa [#allocation4], 0  ;;  %s88_s6 = smov [#allocation2]   ;;  %s40_s10 = scalar_lea.hbm %s124_s0, 128 }
   0x2   :  { %s14_s7 = sshll.u32 %s88_s6, 4  ;;  %p41_p0 = scmp.ne.s32.totalorder %s124_s0, %s40_s10  ;;  %s15_s7 = int_to_ptr.vmem [resolvable:$true] %s14_s7 }
   0x3   :  { %p44_p1 = scmp.lt.u32.totalorder %s40_s10, %s124_s0 }
   0x5   :  { %p46_p2 = pnand %p44_p1, %p41_p0 }
   0x7   :  { %49 = shalt.err (!%p46_p2)
}
   0x8   :  { %s50_s15 = scalar_lea.vmem %s15_s7, 128  ;;  %p55_p4 = scmp.lt.s32.totalorder %s15_s7, %s15_s7 }
   0x9   :  { %p51_p3 = scmp.ne.s32.totalorder %s15_s7, %s50_s15  ;;  %p56_p5 = scmp.lt.s32.totalorder %s50_s15, %s50_s15 }
   0xb   :  { %p57_p6 = por %p56_p5, %p55_p4 }
   0xd   :  { %p58_p7 = pnand %p57_p6, %p51_p3 }
   0xf   :  { %61 = shalt.err (!%p58_p7)
}
  0x10   :  { %17 = dma.hbm_to_vmem [thread:$0]  %s124_s0, 128, %s15_s7, [#allocation3]  }
  0x11   :  { %84 = dma.done.wait [#allocation3], 128  }
  0x12   :  { %85 = vsyncadd [#allocation3], 4294967168  ;;  %s89_s18 = smov [#allocation5]   ;;  %v21_v0 = vld [vmem:[#allocation2] sm:$0xff] }
  0x13   :  { %s29_s19 = sshll.u32 %s89_s18, 4  ;;  %22 = vst [vmem:[#allocation5] sm:$0xff] %v21_v0  ;;  %s30_s19 = int_to_ptr.vmem [resolvable:$true] %s29_s19 }
  0x14   :  { %s62_s20 = scalar_lea.vmem %s30_s19, 128  ;;  %p67_p9 = scmp.lt.s32.totalorder %s30_s19, %s30_s19 }
  0x15   :  { %p63_p8 = scmp.ne.s32.totalorder %s30_s19, %s62_s20  ;;  %p68_p10 = scmp.lt.s32.totalorder %s62_s20, %s62_s20 }
  0x17   :  { %p69_p11 = por %p68_p10, %p67_p9 }
  0x19   :  { %p70_p12 = pnand %p69_p11, %p63_p8 }
  0x1b   :  { %73 = shalt.err (!%p70_p12)
}
  0x1c   :  { %s74_s23 = scalar_lea.hbm %s125_s1, 128 }
  0x1d   :  { %p75_p13 = scmp.ne.s32.totalorder %s125_s1, %s74_s23  ;;  %p78_p0 = scmp.lt.u32.totalorder %s74_s23, %s125_s1 }
  0x1f   :  { %p80_p1 = pnand %p78_p0, %p75_p13 }
  0x21   :  { %83 = shalt.err (!%p80_p1)
}
  0x22   :  { %32 = dma.vmem_to_hbm [thread:$0]  %s30_s19, 128, %s125_s1, [#allocation4]  }
  0x23   :  { %86 = dma.done.wait [#allocation4], 128  }
  0x24   :  { %87 = vsyncadd [#allocation4], 4294967168 }
  0x25   :  { %36 = vsyncpa [#allocation3], 1 }
  0x26   :  { %37 = vsyncpa [#allocation4], 1 }

// kernel: tpu_custom_call.1
= control target key start
LH: loop header
LB: loop body
LE: loop exit
PB: predicated region body
PF: predicated region fallthrough
CT: control target
= control target key end

     0   :  { %10 = vsyncpa [#allocation3], 0  ;;  %s1906_s0 = inlined_call_operand.hbm [shape: f32[512,128], index: 0, kind: input, shape index: {}]   ;;  %s1907_s1 = inlined_call_operand.hbm [shape: bf16[128,128], index: 1, kind: input, shape index: {}]   ;;  %s1908_s2 = inlined_call_operand.vmem [shape: f32[1,128], index: 2, kind: input, shape index: {}]   ;;  %s1909_s3 = inlined_call_operand.hbm [shape: bf16[128,128], index: 3, kind: input, shape index: {}]   ;;  %s1910_s4 = inlined_call_operand.vmem [shape: f32[1,128], index: 4, kind: input, shape index: {}]   ;;  %s1911_s5 = inlined_call_operand.hbm [shape: bf16[512,128], index: 5, kind: output, shape index: {}]  }
   0x1   :  { %12 = vsyncpa [#allocation3 + $0x1], 0 }
   0x2   :  { %13 = vsyncpa [#allocation6], 0 }
   0x3   :  { %14 = vsyncpa [#allocation4], 0 }
   0x4   :  { %16 = vsyncpa [#allocation4 + $0x1], 0  ;;  %s1537_s18 = smov 0   ;;  %s1539_s19 = smov 0  }
   0x5   :  { %s1541_s20 = smov 0   ;;  %s1543_s21 = smov 0  }
   0x6 LB: > { %s1558_s22 = sadd.s32 4294967295, %s1495_s21   ;;  %s973_s23 = sadd.s32 4294967294, %s1495_s21   ;;  %s1495_s21 = sphi %s1543_s21, %s1930_s21   ;;  %s1491_s20 = sphi %s1541_s20, %s1929_s20   ;;  %s1487_s19 = sphi %s1539_s19, %s1928_s19   ;;  %s1483_s18 = sphi %s1537_s18, %s1927_s18  }
   0x7   : > { %p42_p0 = scmp.ne.s32.totalorder %s1487_s19, %s1483_s18  ;;  %p1912_p1 = scmp.eq.s32.totalorder %s1558_s22, 0 }
   0x8   : > { %p156_p3 = scmp.eq.s32.totalorder %s973_s23, 3  ;;  %p974_p5 = scmp.ge.s32.totalorder %s1495_s21, 1 }
   0x9   : > { %p1567_p4 = por %p1912_p1, %p42_p0  ;;  %p163_p7 = scmp.lt.s32.totalorder %s1495_s21, 5 }
   0xa   : > { %p1572_p6 = por %p156_p3, %p42_p0  ;;  %s1497_s27 = smov [#allocation5]  }
   0xb   : > { %s1915_s24 = scalar_select %p1567_p4, 1, 0 }
   0xc   : > { %s1916_s25 = scalar_select %p1572_p6, 1, 0 }
   0xd   : > { %p1577_p8 = pnand %p974_p5, %p163_p7  ;;  %s175_s28 = sshll.u32 %s1497_s27, 4  ;;  %s176_s28 = int_to_ptr.vmem [resolvable:$true] %s175_s28 }
   0xe   : > { %s1498_s30 = smov [#allocation7]   ;;  %s1339_s9 = scalar_lea.hbm %s1907_s1, 1024 }
   0xf   : > { %s1917_s26 = scalar_select %p1577_p8, 1, 0 }
  0x10   : > { %p1198_p9 = pneg %p1577_p8  ;;  %s191_s6 = sshll.u32 %s1498_s30, 4  ;;  %s1589_s6 = int_to_ptr.vmem [resolvable:$true] %s191_s6 }
  0x11   : > { %p1340_p11 = scmp.ne.s32.totalorder %s1907_s1, %s1339_s9  ;;  %p1346_p3 = scmp.lt.u32.totalorder %s1339_s9, %s1907_s1 }
  0x12   : > { %p1585_p10 = pnand %p1198_p9, %p1912_p1 }
  0x14   : > { %p1341_p12 = pneg %p1585_p10 }
  0x16   : > { %p1342_p13 = pnand %p1341_p12, %p1340_p11 }
  0x18   : > { %p1343_p0 = pneg %p1342_p13 }
  0x1a   : > { %p1348_p5 = pnand %p1346_p3, %p1343_p0 }
  0x1c   : > { %1351 = shalt.err (!%p1348_p5)
}
  0x1d   : > { %s1352_s14 = scalar_lea.vmem %s176_s28, 1024  ;;  %p1360_p2 = scmp.lt.s32.totalorder %s176_s28, %s176_s28 }
  0x1e   : > { %p1353_p7 = scmp.ne.s32.totalorder %s176_s28, %s1352_s14  ;;  %p1361_p6 = scmp.lt.s32.totalorder %s1352_s14, %s1352_s14 }
  0x20   : > { %p1355_p9 = pnand %p1353_p7, %p1341_p12  ;;  %p1362_p4 = por %p1361_p6, %p1360_p2 }
  0x22   : > { %p1356_p1 = pneg %p1355_p9 }
  0x24   : > { %p1363_p8 = pnand %p1362_p4, %p1356_p1 }
  0x26   : > { %1366 = shalt.err (!%p1363_p8)
}
  0x27   : > { %s1499_s15 = smov 64   ;;  %s1500_s16 = smov 4  }
  0x28   : > { %1201 = dma.hbm_to_vmem [thread:$0]  (!%p1585_p10), %s1907_s1, 1024, %s176_s28, [#allocation6], %s1499_s15, %s1499_s15, %s1500_s16  }
  0x29   : > { %s1367_s7 = scalar_lea.hbm %s1909_s3, 1024 }
  0x2a   : > { %p1368_p11 = scmp.ne.s32.totalorder %s1909_s3, %s1367_s7  ;;  %p1374_p4 = scmp.lt.u32.totalorder %s1367_s7, %s1909_s3 }
  0x2c   : > { %p1370_p1 = pnand %p1368_p11, %p1341_p12 }
  0x2e   : > { %p1371_p2 = pneg %p1370_p1 }
  0x30   : > { %p1376_p6 = pnand %p1374_p4, %p1371_p2 }
  0x32   : > { %1379 = shalt.err (!%p1376_p6)
}
  0x33   : > { %s1380_s28 = scalar_lea.vmem %s1589_s6, 1024  ;;  %p1388_p3 = scmp.lt.s32.totalorder %s1589_s6, %s1589_s6 }
  0x34   : > { %p1381_p8 = scmp.ne.s32.totalorder %s1589_s6, %s1380_s28  ;;  %p1389_p5 = scmp.lt.s32.totalorder %s1380_s28, %s1380_s28 }
  0x36   : > { %p1383_p13 = pnand %p1381_p8, %p1341_p12  ;;  %p1390_p7 = por %p1389_p5, %p1388_p3 }
  0x38   : > { %p1384_p0 = pneg %p1383_p13 }
  0x3a   : > { %p1391_p9 = pnand %p1390_p7, %p1384_p0 }
  0x3c   : > { %1394 = shalt.err (!%p1391_p9)
}
  0x3d   : > { %1204 = dma.hbm_to_vmem [thread:$0]  (!%p1585_p10), %s1909_s3, 1024, %s1589_s6, [#allocation6], %s1499_s15, %s1499_s15, %s1500_s16  }
  0x3e   : > { %s1639_s14 = sadd.s32 1, %s1495_s21   ;;  %s29_s29 = sadd.s32 1, %s1491_s20 }
  0x3f   : > { %s26_s17 = ssub.s32 %s1495_s21, %s1639_s14  ;;  %p36_p12 = scmp.ne.s32.totalorder %s1491_s20, %s1487_s19 }
  0x40   : > { %p27_p11 = scmp.eq.s32.totalorder %s26_s17, 0  ;;  %p37_p1 = scmp.eq.s32.totalorder %s1495_s21, 0 }
  0x41   : > { %p1919_p2 = scmp.eq.s32.totalorder %s1558_s22, 3  ;;  %p1215_p6 = scmp.lt.s32.totalorder %s1495_s21, 4 }
  0x42   : > { %s1655_s27 = scalar_select %p27_p11, %s1491_s20, %s29_s29  }
  0x43   : > { %p1649_p4 = por %p1919_p2, %p36_p12  ;;  %p38_p8 = por %p37_p1, %p36_p12 }
  0x44   : > { %s208_s30 = sand.u32 1, %s1491_s20   ;;  %s1025_s6 = sshll.u32 %s1495_s21, 11 }
  0x45   : > { %s978_s7 = sshll.u32 %s208_s30, 7  ;;  %s1662_s8 = scalar_lea.hbm %s1906_s0, %s1025_s6 }
  0x46   : > { %s212_s9 = scalar_lea.vmem [#allocation2], %s978_s7  ;;  %p1666_p10 = pnand %p1215_p6, %p38_p8 }
  0x47   : > { %s219_s10 = sshll.u32 %s212_s9, 4  ;;  %s1670_s28 = scalar_lea.sflag [#allocation3], %s208_s30  ;;  %s1664_s10 = int_to_ptr.vmem [resolvable:$true] %s219_s10 }
  0x48   : > { %s1395_s12 = scalar_lea.hbm %s1662_s8, 2048  ;;  %p1397_p0 = pneg %p1666_p10 }
  0x49   : > { %p1396_p13 = scmp.ne.s32.totalorder %s1662_s8, %s1395_s12  ;;  %s1400_s17 = scalar_lea.hbm %s1906_s0, 8192 }
  0x4a   : > { %p1401_p7 = scmp.lt.u32.totalorder %s1662_s8, %s1906_s0  ;;  %p1402_p9 = scmp.lt.u32.totalorder %s1400_s17, %s1395_s12 }
  0x4b   : > { %p1398_p3 = pnand %p1397_p0, %p1396_p13  ;;  %p1404_p11 = scmp.lt.u32.totalorder %s1395_s12, %s1662_s8 }
  0x4c   : > { %p1403_p12 = por %p1402_p9, %p1401_p7 }
  0x4d   : > { %p1399_p5 = pneg %p1398_p3 }
  0x4e   : > { %p1405_p1 = por %p1404_p11, %p1403_p12 }
  0x50   : > { %p1406_p2 = pnand %p1405_p1, %p1399_p5 }
  0x52   : > { %1409 = shalt.err (!%p1406_p2)
}
  0x53   : > { %s1410_s30 = scalar_lea.vmem %s1664_s10, 2048  ;;  %s1501_s15 = smov [#allocation2]  }
  0x54   : > { %p1411_p6 = scmp.ne.s32.totalorder %s1664_s10, %s1410_s30  ;;  %s1415_s16 = sshll.u32 %s1501_s15, 4  ;;  %s1416_s16 = int_to_ptr.vmem [resolvable:$false] %s1415_s16 }
  0x55   : > { %s1417_s9 = scalar_lea.vmem %s1416_s16, 4096  ;;  %p1418_p3 = scmp.lt.s32.totalorder %s1664_s10, %s1416_s16 }
  0x56   : > { %p1413_p8 = pnand %p1411_p6, %p1397_p0  ;;  %p1419_p7 = scmp.lt.s32.totalorder %s1417_s9, %s1410_s30 }
  0x58   : > { %p1414_p13 = pneg %p1413_p8  ;;  %p1420_p9 = por %p1419_p7, %p1418_p3 }
  0x5a   : > { %p1421_p12 = pnand %p1420_p9, %p1414_p13 }
  0x5c   : > { %1424 = shalt.err (!%p1421_p12)
}
  0x5d   : > { %s1502_s12 = smov 128   ;;  %s1503_s13 = smov 8  }
  0x5e   : > { %1208 = dma.hbm_to_vmem [thread:$0]  (!%p1666_p10), %s1662_s8, 2048, %s1664_s10, %s1670_s28, %s1502_s12, %s1502_s12, %s1503_s13  }
  0x5f   : > { %p1922_p0 = scmp.ne.s32.totalorder %s1917_s26, 0 }
  0x60   : > { %s1701_s29 = sand.u32 (!%p1922_p0), 1, %s1487_s19   ;;  %p1923_p5 = scmp.ne.s32.totalorder (!%p1922_p0), %s1915_s24, 0 }
  0x61   : > { %231 = sbr.rel (%p1922_p0) target bundleno = 936 (0x3a8), region = 40  ;;  %s982_s17 = sshll.u32 (!%p1922_p0), %s1701_s29, 7 }
  0x62   : > { %s234_s7 = scalar_lea.sflag (!%p1922_p0), [#allocation3], %s1701_s29  ;;  %s1705_s6 = scalar_lea.vmem (!%p1922_p0), [#allocation2], %s982_s17 }
  0x68   : > { %1470 = dma.done.wait (%p1923_p5), %s234_s7, 2048  }
  0x69   : > { %1472 = vsyncadd (%p1923_p5), %s234_s7, 4294965248  ;;  %p1924_p10 = scmp.eq.s32.totalorder %s1558_s22, 0 }
  0x6b   : > { %1474 = dma.done.wait (%p1924_p10), [#allocation6], 2048   ;;  %p1925_p11 = pmov %p1924_p10 }
  0x6c   : > { %v1259_v0 = vld [vmem:[#allocation5] sm:$0xff]   ;;  %v1260_v1 = vld [vmem:[#allocation5 + $0x8] sm:$0xff]   ;;  %v1261_v2 = vld [vmem:[#allocation5 + $0x10] sm:$0xff]   ;;  %s985_s11 = sshll.u32 %s1701_s29, 6  ;;  %s1042_s15 = sshll.u32 %s1558_s22, 10 }
  0x6d   : > { %1476 = vsyncadd (%p1925_p11), [#allocation6], 4294965248  ;;  %1122 = vmatprep.subr.bf16.mxu0 %v1259_v0  ;;  %v1262_v3 = vld [vmem:[#allocation5 + $0x18] sm:$0xff]   ;;  %v275_v4 = vld [vmem:[%s1705_s6] sm:$0xff]  ;;  %s1846_s28 = scalar_lea.vmem [#allocation8], %s985_s11  ;;  %s1861_s12 = scalar_lea.hbm %s1911_s5, %s1042_s15 }
  0x6e   : > { %1123 = vmatpush3.bf16.msra.mxu0 %v1259_v0  ;;  %v276_v5 = vld [vmem:[%s1705_s6 + $0x8] sm:$0xff]  ;;  %v1263_v7 = vld [vmem:[#allocation5 + $0x20] sm:$0xff]   ;;  %v1265_v9 = vld [vmem:[#allocation5 + $0x30] sm:$0xff]   ;;  %s881_s30 = sshll.u32 %s1846_s28, 4  ;;  %s868_s22 = scalar_lea.sflag [#allocation4], %s1701_s29  ;;  %s1856_s30 = int_to_ptr.vmem [resolvable:$true] %s881_s30 }
  0x6f   : > { %1124 = vmatprep.subr.bf16.mxu0 %v1260_v1  ;;  %v291_v6 = vpack.c.bf16 %v276_v5, %v275_v4  ;;  %v1264_v8 = vld [vmem:[#allocation5 + $0x28] sm:$0xff]   ;;  %v1266_v10 = vld [vmem:[#allocation5 + $0x38] sm:$0xff]   ;;  %v277_v11 = vld [vmem:[%s1705_s6 + $0x10] sm:$0xff]  ;;  %s1425_s13 = scalar_lea.vmem %s1856_s30, 1024  ;;  %s1504_s17 = smov [#allocation8]  }
  0x70   : > { %v278_v12 = vld [vmem:[%s1705_s6 + $0x18] sm:$0xff]  ;;  %v279_v13 = vld [vmem:[%s1705_s6 + $0x20] sm:$0xff]  ;;  %v280_v14 = vld [vmem:[%s1705_s6 + $0x28] sm:$0xff]  ;;  %p1426_p1 = scmp.ne.s32.totalorder %s1856_s30, %s1425_s13  ;;  %s1429_s7 = sshll.u32 %s1504_s17, 4  ;;  %s1430_s7 = int_to_ptr.vmem [resolvable:$false] %s1429_s7 }
  0x71   : > { %1138 = vmatprep.mubr.bf16.mxu0 %v291_v6  ;;  %v292_v15 = vpack.c.bf16 %v278_v12, %v277_v11  ;;  %v293_v16 = vpack.c.bf16 %v280_v14, %v279_v13  ;;  %v281_v17 = vld [vmem:[%s1705_s6 + $0x30] sm:$0xff]  ;;  %v282_v18 = vld [vmem:[%s1705_s6 + $0x38] sm:$0xff]  ;;  %v283_v19 = vld [vmem:[%s1705_s6 + $0x40] sm:$0xff]  ;;  %p1432_p8 = scmp.lt.s32.totalorder %s1856_s30, %s1430_s7 }
  0x72   : > { %1125 = vmatpush3.bf16.msra.mxu0 %v1260_v1  ;;  %v284_v20 = vld [vmem:[%s1705_s6 + $0x48] sm:$0xff]  ;;  %v294_v21 = vpack.c.bf16 %v282_v18, %v281_v17  ;;  %v285_v23 = vld [vmem:[%s1705_s6 + $0x50] sm:$0xff]  ;;  %v286_v24 = vld [vmem:[%s1705_s6 + $0x58] sm:$0xff]  ;;  %p1427_p2 = pnand %p1426_p1, %p1649_p4 }
  0x73   : > { %1126 = vmatprep.subr.bf16.mxu0 %v1261_v2  ;;  %v295_v22 = vpack.c.bf16 %v284_v20, %v283_v19  ;;  %v287_v25 = vld [vmem:[%s1705_s6 + $0x60] sm:$0xff]  ;;  %v288_v26 = vld [vmem:[%s1705_s6 + $0x68] sm:$0xff]  ;;  %v296_v27 = vpack.c.bf16 %v286_v24, %v285_v23  ;;  %v289_v29 = vld [vmem:[%s1705_s6 + $0x70] sm:$0xff] }
  0x74   : > { %v297_v28 = vpack.c.bf16 %v288_v26, %v287_v25  ;;  %v290_v30 = vld [vmem:[%s1705_s6 + $0x78] sm:$0xff]  ;;  %v986_v32 = vld [vmem:[%s1908_s2] ss:$0 sm:$0xff]  ;;  %p1428_p6 = pneg %p1427_p2  ;;  %s1431_s6 = scalar_lea.vmem %s1430_s7, 2048 }
  0x75   : > { %v298_v31 = vpack.c.bf16 %v290_v30, %v289_v29  ;;  %v1267_v1 = vld [vmem:[#allocation7] sm:$0xff]   ;;  %p1433_p13 = scmp.lt.s32.totalorder %s1431_s6, %s1425_s13 }
  0x76   : > { %1127 = vmatpush3.bf16.msra.mxu0 %v1261_v2  ;;  %v1268_v2 = vld [vmem:[#allocation7 + $0x8] sm:$0xff]   ;;  %1154 = vmatprep.subr.bf16.mxu1 %v1267_v1 }
  0x77   : > { %1128 = vmatprep.subr.bf16.mxu0 %v1262_v3  ;;  %1155 = vmatpush3.bf16.msra.mxu1 %v1267_v1  ;;  %v1271_v1 = vld [vmem:[#allocation7 + $0x20] sm:$0xff]   ;;  %p1434_p3 = por %p1433_p13, %p1432_p8 }
  0x78   : > { %1156 = vmatprep.subr.bf16.mxu1 %v1268_v2 }
  0x79   : > { %p1435_p7 = pnand %p1434_p3, %p1428_p6 }
  0x7a   : > { %1129 = vmatpush3.bf16.msra.mxu0 %v1262_v3  ;;  %v1269_v3 = vld [vmem:[#allocation7 + $0x10] sm:$0xff]  }
  0x7b   : > { %1130 = vmatprep.subr.bf16.mxu0 %v1263_v7  ;;  %1157 = vmatpush3.bf16.msra.mxu1 %v1268_v2 }
  0x7c   : > { %1158 = vmatprep.subr.bf16.mxu1 %v1269_v3 }
  0x7e   : > { %1131 = vmatpush3.bf16.msra.mxu0 %v1263_v7 }
  0x7f   : > { %1132 = vmatprep.subr.bf16.mxu0 %v1264_v8  ;;  %1159 = vmatpush3.bf16.msra.mxu1 %v1269_v3  ;;  %v1272_v3 = vld [vmem:[#allocation7 + $0x28] sm:$0xff]  }
  0x82   : > { %1133 = vmatpush3.bf16.msra.mxu0 %v1264_v8 }
  0x83   : > { %1134 = vmatprep.subr.bf16.mxu0 %v1265_v9 }
  0x86   : > { %1135 = vmatpush3.bf16.msra.mxu0 %v1265_v9 }
  0x87   : > { %1136 = vmatprep.subr.bf16.mxu0 %v1266_v10 }
  0x8a   : > { %1137 = vmatpush3.bf16.msra.mxu0 %v1266_v10 }
  0x8d   : > { %1139 = vmatmul.mubr.bf16.vlgmr.msra.gmra.mrb[0].mxu0 %v292_v15 }
  0x8e   : > { %1142 = vmatprep.mubr.bf16.mxu0 %v293_v16 }
  0x95   : > { %1143 = vmatmul.mubr.bf16.gmra.mrb[4].mxu0 %v294_v21 }
  0x96   : > { %1146 = vmatprep.mubr.bf16.mxu0 %v295_v22 }
  0x9d   : > { %1147 = vmatmul.mubr.bf16.gmra.mrb[8].mxu0 %v296_v27 }
  0x9e   : > { %1150 = vmatprep.mubr.bf16.mxu0 %v297_v28 }
  0xa5   : > { %1151 = vmatmul.mubr.bf16.gmra.mrb[12].mxu0 %v298_v31 }
 0x160   : > { %v1140_v33 = vpop.f32.mrb[0].mxu0 }
 0x161   : > { %v413_v34 = vadd.f32 %v1140_v33, %v986_v32  ;;  %v404_v35 = vpop.f32.mrb[1].mxu0 }
 0x162   : > { %v405_v36 = vadd.f32 %v986_v32, %v404_v35  ;;  %v1141_v37 = vpop.f32.mrb[2].mxu0 }
 0x163   : > { %471 = vmax.xlane.f32.xlu1 %v413_v34  ;;  %v407_v38 = vpop.f32.mrb[3].mxu0  ;;  %v416_v39 = vadd.f32 %v1141_v37, %v986_v32 }
 0x164   : > { %467 = vmax.xlane.f32.xlu0 %v405_v36  ;;  %v408_v40 = vadd.f32 %v986_v32, %v407_v38 }
 0x167   : > { %473 = vmax.xlane.f32.xlu1 %v416_v39 }
 0x168   : > { %v1144_v41 = vpop.f32.mrb[4].mxu0  ;;  %469 = vmax.xlane.f32.xlu0 %v408_v40 }
 0x169   : > { %v420_v42 = vpop.f32.mrb[5].mxu0  ;;  %v1736_v47 = vadd.f32 %v1144_v41, %v986_v32 }
 0x16a   : > { %v421_v43 = vadd.f32 %v986_v32, %v420_v42  ;;  %v1145_v44 = vpop.f32.mrb[6].mxu0 }
 0x16b   : > { %v423_v45 = vpop.f32.mrb[7].mxu0  ;;  %v1739_v48 = vadd.f32 %v1145_v44, %v986_v32 }
 0x16c   : > { %v1734_v46 = vadd.f32 %v986_v32, %v423_v45  ;;  %475 = vmax.xlane.f32.xlu0 %v421_v43 }
 0x16e   : > { %477 = vmax.xlane.f32.xlu1 %v1734_v46 }
 0x170   : > { %v1148_v49 = vpop.f32.mrb[8].mxu0  ;;  %479 = vmax.xlane.f32.xlu0 %v1736_v47 }
 0x171   : > { %v436_v50 = vpop.f32.mrb[9].mxu0  ;;  %v1748_v55 = vadd.f32 %v1148_v49, %v986_v32 }
 0x172   : > { %v1742_v51 = vadd.f32 %v986_v32, %v436_v50  ;;  %v1149_v52 = vpop.f32.mrb[10].mxu0  ;;  %481 = vmax.xlane.f32.xlu1 %v1739_v48 }
 0x173   : > { %v439_v53 = vpop.f32.mrb[11].mxu0  ;;  %v1751_v56 = vadd.f32 %v1149_v52, %v986_v32 }
 0x174   : > { %v1745_v54 = vadd.f32 %v986_v32, %v439_v53  ;;  %483 = vmax.xlane.f32.xlu0 %v1742_v51 }
 0x176   : > { %485 = vmax.xlane.f32.xlu1 %v1745_v54 }
 0x178   : > { %v1152_v57 = vpop.f32.mrb[12].mxu0  ;;  %487 = vmax.xlane.f32.xlu0 %v1748_v55 }
 0x179   : > { %v452_v58 = vpop.f32.mrb[13].mxu0  ;;  %v1760_v63 = vadd.f32 %v1152_v57, %v986_v32  ;;  %v1270_v57 = vld [vmem:[#allocation7 + $0x18] sm:$0xff]  }
 0x17a   : > { %v1754_v59 = vadd.f32 %v986_v32, %v452_v58  ;;  %v1153_v60 = vpop.f32.mrb[14].mxu0  ;;  %489 = vmax.xlane.f32.xlu1 %v1751_v56  ;;  %1160 = vmatprep.subr.bf16.mxu1 %v1270_v57 }
 0x17b   : > { %v455_v61 = vpop.f32.mrb[15].mxu0  ;;  %v1763_v0 = vadd.f32 %v1153_v60, %v986_v32  ;;  %1161 = vmatpush3.bf16.msra.mxu1 %v1270_v57 }
 0x17c   : > { %v1757_v62 = vadd.f32 %v986_v32, %v455_v61  ;;  %491 = vmax.xlane.f32.xlu0 %v1754_v59  ;;  %1162 = vmatprep.subr.bf16.mxu1 %v1271_v1 }
 0x17e   : > { %493 = vmax.xlane.f32.xlu1 %v1757_v62 }
 0x17f   : > { %1163 = vmatpush3.bf16.msra.mxu1 %v1271_v1 }
 0x180   : > { %495 = vmax.xlane.f32.xlu0 %v1760_v63  ;;  %1164 = vmatprep.subr.bf16.mxu1 %v1272_v3 }
 0x182   : > { %497 = vmax.xlane.f32.xlu1 %v1763_v0 }
 0x183   : > { %1165 = vmatpush3.bf16.msra.mxu1 %v1272_v3  ;;  %v995_v3 = vld [vmem:[%s1910_s4] ss:$0 sm:$0xff] }
 0x1f0   : > { %v472_v4 = vpop.xlane.xlu1 %471 }
 0x1f1   : > { %v501_v5 = vsub.f32 %v413_v34, %v472_v4  ;;  %v468_v6 = vpop.xlane.xlu0 %467 }
 0x1f2   : > { %v499_v7 = vsub.f32 %v405_v36, %v468_v6  ;;  %v1273_v6 = vld [vmem:[#allocation7 + $0x30] sm:$0xff]  }
 0x1f3   : > { %v519_v10 = vmul.f32 1.442695, %v501_v5  ;;  %1166 = vmatprep.subr.bf16.mxu1 %v1273_v6 }
 0x1f4   : > { %v515_v8 = vmul.f32 1.442695, %v499_v7  ;;  %v474_v9 = vpop.xlane.xlu1 %473  ;;  %1167 = vmatpush3.bf16.msra.mxu1 %v1273_v6 }
 0x1f5   : > { %v502_v11 = vsub.f32 %v416_v39, %v474_v9  ;;  %v470_v12 = vpop.xlane.xlu0 %469 }
 0x1f6   : > { %1275 = vpow2.f32 %v515_v8  ;;  %v500_v13 = vsub.f32 %v408_v40, %v470_v12  ;;  %v1274_v8 = vld [vmem:[#allocation7 + $0x38] sm:$0xff]  }
 0x1f7   : > { %1277 = vpow2.f32 %v519_v10  ;;  %v521_v15 = vmul.f32 1.442695, %v502_v11  ;;  %1168 = vmatprep.subr.bf16.mxu1 %v1274_v8 }
 0x1f8   : > { %v517_v14 = vmul.f32 1.442695, %v500_v13  ;;  %1169 = vmatpush3.bf16.msra.mxu1 %v1274_v8 }
 0x1f9   : > { %v476_v16 = vpop.xlane.xlu0 %475 }
 0x1fa   : > { %1279 = vpow2.f32 %v517_v14  ;;  %v503_v17 = vsub.f32 %v421_v43, %v476_v16 }
 0x1fb   : > { %v478_v18 = vpop.xlane.xlu1 %477  ;;  %1281 = vpow2.f32 %v521_v15 }
 0x1fc   : > { %v523_v19 = vmul.f32 1.442695, %v503_v17  ;;  %v504_v20 = vsub.f32 %v1734_v46, %v478_v18 }
 0x1fd   : > { %v480_v21 = vpop.xlane.xlu0 %479 }
 0x1fe   : > { %1283 = vpow2.f32 %v523_v19  ;;  %v525_v22 = vmul.f32 1.442695, %v504_v20  ;;  %v505_v23 = vsub.f32 %v1736_v47, %v480_v21 }
 0x1ff   : > { %v482_v24 = vpop.xlane.xlu1 %481 }
 0x200   : > { %v1769_v25 = vpop.eup %1275  ;;  %v527_v26 = vmul.f32 1.442695, %v505_v23  ;;  %v506_v27 = vsub.f32 %v1739_v48, %v482_v24  ;;  %1285 = vpow2.f32 %v525_v22 }
 0x201   : > { %547 = vadd.xlane.f32.xlu0 %v1769_v25  ;;  %v484_v28 = vpop.xlane.xlu0 %483  ;;  %v1774_v31 = vpop.eup %1277 }
 0x202   : > { %1287 = vpow2.f32 %v527_v26  ;;  %v529_v29 = vmul.f32 1.442695, %v506_v27  ;;  %v507_v30 = vsub.f32 %v1742_v51, %v484_v28 }
 0x203   : > { %v486_v32 = vpop.xlane.xlu1 %485 }
 0x204   : > { %v1776_v33 = vpop.eup %1279  ;;  %v531_v34 = vmul.f32 1.442695, %v507_v30  ;;  %v508_v35 = vsub.f32 %v1745_v54, %v486_v32  ;;  %1289 = vpow2.f32 %v529_v29 }
 0x205   : > { %551 = vadd.xlane.f32.xlu0 %v1774_v31  ;;  %549 = vadd.xlane.f32.xlu1 %v1776_v33  ;;  %v488_v36 = vpop.xlane.xlu0 %487  ;;  %v1782_v39 = vpop.eup %1281 }
 0x206   : > { %1291 = vpow2.f32 %v531_v34  ;;  %v533_v37 = vmul.f32 1.442695, %v508_v35  ;;  %v509_v38 = vsub.f32 %v1748_v55, %v488_v36 }
 0x207   : > { %v490_v40 = vpop.xlane.xlu1 %489 }
 0x208   : > { %v1784_v41 = vpop.eup %1283  ;;  %v535_v42 = vmul.f32 1.442695, %v509_v38  ;;  %v510_v43 = vsub.f32 %v1751_v56, %v490_v40  ;;  %1293 = vpow2.f32 %v533_v37 }
 0x209   : > { %553 = vadd.xlane.f32.xlu1 %v1782_v39  ;;  %555 = vadd.xlane.f32.xlu0 %v1784_v41  ;;  %v492_v44 = vpop.xlane.xlu0 %491 }
 0x20a   : > { %1295 = vpow2.f32 %v535_v42  ;;  %v537_v45 = vmul.f32 1.442695, %v510_v43  ;;  %v511_v46 = vsub.f32 %v1754_v59, %v492_v44  ;;  %v1790_v47 = vpop.eup %1285 }
 0x20b   : > { %v494_v48 = vpop.xlane.xlu1 %493 }
 0x20c   : > { %v1792_v49 = vpop.eup %1287  ;;  %v539_v50 = vmul.f32 1.442695, %v511_v46  ;;  %v512_v51 = vsub.f32 %v1757_v62, %v494_v48  ;;  %1297 = vpow2.f32 %v537_v45 }
 0x20d   : > { %557 = vadd.xlane.f32.xlu1 %v1790_v47  ;;  %559 = vadd.xlane.f32.xlu0 %v1792_v49  ;;  %v496_v52 = vpop.xlane.xlu0 %495 }
 0x20e   : > { %1299 = vpow2.f32 %v539_v50  ;;  %v541_v53 = vmul.f32 1.442695, %v512_v51  ;;  %v513_v54 = vsub.f32 %v1760_v63, %v496_v52  ;;  %v1798_v55 = vpop.eup %1289 }
 0x20f   : > { %v498_v56 = vpop.xlane.xlu1 %497 }
 0x210   : > { %v1800_v58 = vpop.eup %1291  ;;  %v543_v59 = vmul.f32 1.442695, %v513_v54  ;;  %v514_v60 = vsub.f32 %v1763_v0, %v498_v56  ;;  %1301 = vpow2.f32 %v541_v53 }
 0x211   : > { %561 = vadd.xlane.f32.xlu1 %v1798_v55  ;;  %563 = vadd.xlane.f32.xlu0 %v1800_v58 }
 0x212   : > { %1303 = vpow2.f32 %v543_v59  ;;  %v545_v61 = vmul.f32 1.442695, %v514_v60  ;;  %v1805_v62 = vpop.eup %1293 }
 0x214   : > { %v1807_v63 = vpop.eup %1295  ;;  %1305 = vpow2.f32 %v545_v61 }
 0x215   : > { %565 = vadd.xlane.f32.xlu1 %v1805_v62  ;;  %567 = vadd.xlane.f32.xlu0 %v1807_v63 }
 0x216   : > { %v1811_v0 = vpop.eup %1297 }
 0x218   : > { %v1813_v2 = vpop.eup %1299 }
 0x219   : > { %569 = vadd.xlane.f32.xlu1 %v1811_v0  ;;  %571 = vadd.xlane.f32.xlu0 %v1813_v2 }
 0x21a   : > { %v1817_v4 = vpop.eup %1301 }
 0x21c   : > { %v1819_v5 = vpop.eup %1303 }
 0x21d   : > { %573 = vadd.xlane.f32.xlu1 %v1817_v4  ;;  %575 = vadd.xlane.f32.xlu0 %v1819_v5 }
 0x21e   : > { %v1823_v7 = vpop.eup %1305 }
 0x221   : > { %577 = vadd.xlane.f32.xlu1 %v1823_v7 }
 0x28e   : > { %v548_v9 = vpop.xlane.xlu0 %547 }
 0x28f   : > { %1307 = vrcp.f32 %v548_v9 }
 0x292   : > { %v550_v10 = vpop.xlane.xlu1 %549  ;;  %v552_v11 = vpop.xlane.xlu0 %551 }
 0x293   : > { %1309 = vrcp.f32 %v550_v10 }
 0x294   : > { %1311 = vrcp.f32 %v552_v11 }
 0x296   : > { %v554_v12 = vpop.xlane.xlu1 %553  ;;  %v556_v13 = vpop.xlane.xlu0 %555 }
 0x297   : > { %1313 = vrcp.f32 %v554_v12 }
 0x298   : > { %1315 = vrcp.f32 %v556_v13 }
 0x299   : > { %v1308_v16 = vpop.eup %1307 }
 0x29a   : > { %v558_v14 = vpop.xlane.xlu1 %557  ;;  %v560_v15 = vpop.xlane.xlu0 %559  ;;  %v595_v20 = vmul.f32 %v1308_v16, %v1769_v25 }
 0x29b   : > { %1317 = vrcp.f32 %v558_v14 }
 0x29c   : > { %1319 = vrcp.f32 %v560_v15 }
 0x29d   : > { %v1310_v17 = vpop.eup %1309 }
 0x29e   : > { %v562_v18 = vpop.xlane.xlu1 %561  ;;  %v564_v19 = vpop.xlane.xlu0 %563  ;;  %v596_v21 = vmul.f32 %v1310_v17, %v1776_v33 }
 0x29f   : > { %v1312_v22 = vpop.eup %1311  ;;  %1321 = vrcp.f32 %v562_v18 }
 0x2a0   : > { %v611_v23 = vpack.c.bf16 %v596_v21, %v595_v20  ;;  %1323 = vrcp.f32 %v564_v19  ;;  %v597_v28 = vmul.f32 %v1312_v22, %v1774_v31 }
 0x2a1   : > { %v1314_v24 = vpop.eup %1313 }
 0x2a2   : > { %v566_v26 = vpop.xlane.xlu1 %565  ;;  %1170 = vmatprep.mubr.bf16.mxu1 %v611_v23  ;;  %v568_v27 = vpop.xlane.xlu0 %567  ;;  %v598_v29 = vmul.f32 %v1314_v24, %v1782_v39 }
 0x2a3   : > { %v1316_v30 = vpop.eup %1315  ;;  %1325 = vrcp.f32 %v566_v26 }
 0x2a4   : > { %v612_v32 = vpack.c.bf16 %v598_v29, %v597_v28  ;;  %1327 = vrcp.f32 %v568_v27  ;;  %v599_v35 = vmul.f32 %v1316_v30, %v1784_v41 }
 0x2a5   : > { %v1318_v34 = vpop.eup %1317 }
 0x2a6   : > { %v570_v25 = vpop.xlane.xlu1 %569  ;;  %1171 = vmatmul.mubr.bf16.vlgmr.msra.gmra.mrb[0].mxu1 %v612_v32  ;;  %v572_v33 = vpop.xlane.xlu0 %571  ;;  %v600_v36 = vmul.f32 %v1318_v34, %v1790_v47 }
 0x2a7   : > { %v1320_v37 = vpop.eup %1319  ;;  %1329 = vrcp.f32 %v570_v25 }
 0x2a8   : > { %v613_v38 = vpack.c.bf16 %v600_v36, %v599_v35  ;;  %1331 = vrcp.f32 %v572_v33  ;;  %v601_v42 = vmul.f32 %v1320_v37, %v1792_v49 }
 0x2a9   : > { %v1322_v40 = vpop.eup %1321 }
 0x2aa   : > { %v574_v31 = vpop.xlane.xlu1 %573  ;;  %1174 = vmatprep.mubr.bf16.mxu1 %v613_v38  ;;  %v576_v39 = vpop.xlane.xlu0 %575  ;;  %v602_v43 = vmul.f32 %v1322_v40, %v1798_v55 }
 0x2ab   : > { %v1324_v44 = vpop.eup %1323  ;;  %1333 = vrcp.f32 %v574_v31 }
 0x2ac   : > { %v614_v45 = vpack.c.bf16 %v602_v43, %v601_v42  ;;  %1335 = vrcp.f32 %v576_v39  ;;  %v603_v47 = vmul.f32 %v1324_v44, %v1800_v58 }
 0x2ad   : > { %v1326_v46 = vpop.eup %1325 }
 0x2ae   : > { %v578_v41 = vpop.xlane.xlu1 %577  ;;  %1175 = vmatmul.mubr.bf16.gmra.mrb[4].mxu1 %v614_v45  ;;  %v604_v48 = vmul.f32 %v1326_v46, %v1805_v62  ;;  %v1328_v50 = vpop.eup %1327 }
 0x2af   : > { %1337 = vrcp.f32 %v578_v41  ;;  %v605_v49 = vmul.f32 %v1328_v50, %v1807_v63 }
 0x2b0   : > { %v615_v51 = vpack.c.bf16 %v604_v48, %v603_v47 }
 0x2b1   : > { %v1330_v52 = vpop.eup %1329 }
 0x2b2   : > { %1178 = vmatprep.mubr.bf16.mxu1 %v615_v51  ;;  %v606_v53 = vmul.f32 %v1330_v52, %v1811_v0  ;;  %v1332_v54 = vpop.eup %1331 }
 0x2b3   : > { %v607_v57 = vmul.f32 %v1332_v54, %v1813_v2 }
 0x2b4   : > { %v616_v55 = vpack.c.bf16 %v606_v53, %v605_v49 }
 0x2b5   : > { %v1334_v56 = vpop.eup %1333 }
 0x2b6   : > { %1179 = vmatmul.mubr.bf16.gmra.mrb[8].mxu1 %v616_v55  ;;  %v608_v58 = vmul.f32 %v1334_v56, %v1817_v4  ;;  %v1336_v59 = vpop.eup %1335 }
 0x2b7   : > { %v609_v62 = vmul.f32 %v1336_v59, %v1819_v5 }
 0x2b8   : > { %v617_v60 = vpack.c.bf16 %v608_v58, %v607_v57 }
 0x2b9   : > { %v1338_v61 = vpop.eup %1337 }
 0x2ba   : > { %1182 = vmatprep.mubr.bf16.mxu1 %v617_v60  ;;  %v610_v1 = vmul.f32 %v1338_v61, %v1823_v7 }
 0x2bc   : > { %v618_v63 = vpack.c.bf16 %v610_v1, %v609_v62 }
 0x2be   : > { %1183 = vmatmul.mubr.bf16.gmra.mrb[12].mxu1 %v618_v63 }
 0x379   : > { %v1172_v0 = vpop.f32.mrb[0].mxu1 }
 0x37a   : > { %v724_v6 = vpop.f32.mrb[1].mxu1  ;;  %v733_v8 = vadd.f32 %v1172_v0, %v995_v3 }
 0x37b   : > { %v1173_v2 = vpop.f32.mrb[2].mxu1  ;;  %v725_v10 = vadd.f32 %v995_v3, %v724_v6 }
 0x37c   : > { %v736_v4 = vadd.f32 %v1173_v2, %v995_v3  ;;  %v727_v9 = vpop.f32.mrb[3].mxu1 }
 0x37d   : > { %v728_v11 = vadd.f32 %v995_v3, %v727_v9 }
 0x37e   : > { %v1051_v12 = vpack.c.bf16 %v736_v4, %v733_v8 }
 0x37f   : > { %v1046_v13 = vpack.c.bf16 %v728_v11, %v725_v10 }
 0x380   : > { %1083 = vst [vmem:[%s1846_s28 + $0x8] sm:$0xff] %v1051_v12  }
 0x381   : > { %1047 = vst [vmem:[%s1846_s28] sm:$0xff] %v1046_v13   ;;  %v1176_v5 = vpop.f32.mrb[4].mxu1 }
 0x382   : > { %v740_v7 = vpop.f32.mrb[5].mxu1  ;;  %v749_v15 = vadd.f32 %v1176_v5, %v995_v3 }
 0x383   : > { %v1177_v14 = vpop.f32.mrb[6].mxu1  ;;  %v741_v18 = vadd.f32 %v995_v3, %v740_v7 }
 0x384   : > { %v752_v16 = vadd.f32 %v1177_v14, %v995_v3  ;;  %v743_v17 = vpop.f32.mrb[7].mxu1 }
 0x385   : > { %v744_v19 = vadd.f32 %v995_v3, %v743_v17 }
 0x386   : > { %v1061_v20 = vpack.c.bf16 %v752_v16, %v749_v15 }
 0x387   : > { %v1056_v21 = vpack.c.bf16 %v744_v19, %v741_v18 }
 0x388   : > { %1085 = vst [vmem:[%s1846_s28 + $0x18] sm:$0xff] %v1061_v20  }
 0x389   : > { %1084 = vst [vmem:[%s1846_s28 + $0x10] sm:$0xff] %v1056_v21   ;;  %v1180_v22 = vpop.f32.mrb[8].mxu1 }
 0x38a   : > { %v756_v23 = vpop.f32.mrb[9].mxu1  ;;  %v765_v26 = vadd.f32 %v1180_v22, %v995_v3 }
 0x38b   : > { %v1181_v24 = vpop.f32.mrb[10].mxu1  ;;  %v757_v29 = vadd.f32 %v995_v3, %v756_v23 }
 0x38c   : > { %v768_v27 = vadd.f32 %v1181_v24, %v995_v3  ;;  %v759_v28 = vpop.f32.mrb[11].mxu1 }
 0x38d   : > { %v760_v30 = vadd.f32 %v995_v3, %v759_v28 }
 0x38e   : > { %v1071_v32 = vpack.c.bf16 %v768_v27, %v765_v26 }
 0x38f   : > { %v1066_v34 = vpack.c.bf16 %v760_v30, %v757_v29 }
 0x390   : > { %1087 = vst [vmem:[%s1846_s28 + $0x28] sm:$0xff] %v1071_v32  }
 0x391   : > { %1086 = vst [vmem:[%s1846_s28 + $0x20] sm:$0xff] %v1066_v34   ;;  %v1184_v25 = vpop.f32.mrb[12].mxu1 }
 0x392   : > { %v772_v33 = vpop.f32.mrb[13].mxu1  ;;  %v781_v36 = vadd.f32 %v1184_v25, %v995_v3 }
 0x393   : > { %v1185_v35 = vpop.f32.mrb[14].mxu1  ;;  %v773_v40 = vadd.f32 %v995_v3, %v772_v33 }
 0x394   : > { %v784_v37 = vadd.f32 %v1185_v35, %v995_v3  ;;  %v775_v38 = vpop.f32.mrb[15].mxu1 }
 0x395   : > { %v776_v31 = vadd.f32 %v995_v3, %v775_v38 }
 0x396   : > { %v1081_v39 = vpack.c.bf16 %v784_v37, %v781_v36 }
 0x397   : > { %v1076_v42 = vpack.c.bf16 %v776_v31, %v773_v40 }
 0x398   : > { %1089 = vst [vmem:[%s1846_s28 + $0x38] sm:$0xff] %v1081_v39  }
 0x399   : > { %1088 = vst [vmem:[%s1846_s28 + $0x30] sm:$0xff] %v1076_v42  }
 0x39a   : > { %1438 = shalt.err (!%p1435_p7)
}
 0x39b   : > { %s1439_s24 = scalar_lea.hbm %s1861_s12, 1024  ;;  %s1443_s10 = scalar_lea.hbm %s1911_s5, 4096 }
 0x39c   : > { %p1440_p9 = scmp.ne.s32.totalorder %s1861_s12, %s1439_s24  ;;  %p1444_p5 = scmp.lt.u32.totalorder %s1861_s12, %s1911_s5 }
 0x39d   : > { %p1445_p10 = scmp.lt.u32.totalorder %s1443_s10, %s1439_s24  ;;  %p1447_p1 = scmp.lt.u32.totalorder %s1439_s24, %s1861_s12 }
 0x39e   : > { %p1441_p12 = pnand %p1440_p9, %p1649_p4 }
 0x39f   : > { %p1446_p11 = por %p1445_p10, %p1444_p5 }
 0x3a0   : > { %p1442_p0 = pneg %p1441_p12 }
 0x3a1   : > { %p1448_p2 = por %p1447_p1, %p1446_p11 }
 0x3a3   : > { %p1449_p6 = pnand %p1448_p2, %p1442_p0 }
 0x3a5   : > { %1452 = shalt.err (!%p1449_p6)
}
 0x3a6   : > { %s1505_s15 = smov 64   ;;  %s1506_s16 = smov 4  }
 0x3a7   : > { %1196 = dma.vmem_to_hbm [thread:$0]  (%p1649_p4), %s1856_s30, 1024, %s1861_s12, %s868_s22, %s1505_s15, %s1505_s15, %s1506_s16  }
 0x3a8 PF: > { %p1218_p8 = scmp.ge.s32.totalorder %s1495_s21, 2  ;;  %s896_s9 = sand.u32 1, %s1483_s18  }
 0x3a9   : > { %p1926_p13 = scmp.ne.s32.totalorder %s1916_s25, 0  ;;  %s897_s13 = scalar_lea.sflag [#allocation4], %s896_s9 }
 0x3ab   : > { %p1210_p3 = pnand %p1218_p8, %p1926_p13 }
 0x3ad   : > { %1478 = dma.done.wait (!%p1210_p3), %s897_s13, 1024  }
 0x3ae   : > { %1480 = vsyncadd (!%p1210_p3), %s897_s13, 4294966272  ;;  %p19_p7 = scmp.ge.s32.totalorder %s1639_s14, 6   ;;  %s1927_s18 = smov %s1487_s19 }
 0x3af   : > { %s1928_s19 = smov %s1491_s20  ;;  %s1929_s20 = smov %s1655_s27 }
 0x3b0   : > { %s1930_s21 = smov %s1639_s14  ;;  %21 = sbr.rel (!%p19_p7) target bundleno = 6 (0x6), region = 93 }
 0x3b7   :  { %902 = vsyncpa [#allocation3], 1 }
 0x3b8   :  { %904 = vsyncpa [#allocation3 + $0x1], 1 }
 0x3b9   :  { %905 = vsyncpa [#allocation6], 1 }
 0x3ba   :  { %906 = vsyncpa [#allocation4], 1 }
 0x3bb   :  { %908 = vsyncpa [#allocation4 + $0x1], 1 }

</bundles_post_ra>
